<compile_context>
chip_gen: v7x
topology: tpu7x:2x2x1
jax: 0.10.0
libtpu: 0.0.40
codegen_flags: <defaults>
</compile_context>

<pallas_src>
import functools

import jax
import jax.numpy as jnp
from jax import lax
from jax.experimental import pallas as pl
from jax.experimental.pallas import tpu as pltpu

BN_EPS = 1e-5
_LANE = 128
_SUBLANE = 8
_FUSED_VMEM_BUDGET = 24 << 20      # raw-byte budget for the fully fused path
_VMEM_CAP = 56 << 20               # stay under v7x's 64 MiB physical VMEM


def _pad_to(n, m):
    return ((n + m - 1) // m) * m


def _row_mask(b_pad, b_valid):
    """(b_pad, 1) f32 mask of valid batch rows, or None when no padding."""
    if b_valid == b_pad:
        return None
    return (lax.broadcasted_iota(jnp.int32, (b_pad, 1), 0)
            < b_valid).astype(jnp.float32)


def _bn_train(z, g_row, bt_row, inv_b, row_mask):
    """BatchNorm1d (training mode, biased variance) with optional row mask."""
    zm = z if row_mask is None else z * row_mask
    mean = jnp.sum(zm, axis=0, keepdims=True) * inv_b
    centered = z - mean
    cm = centered if row_mask is None else centered * row_mask
    var = jnp.sum(cm * cm, axis=0, keepdims=True) * inv_b
    scale = g_row * lax.rsqrt(var + BN_EPS)          # EUP rsqrt
    shift = bt_row - mean * scale
    return z * scale + shift


# ---------------------------------------------------------------------------
# Kernel 1: whole layer chain fused in one kernel (all tensors VMEM-resident).
# Padded feature columns stay exactly zero through the chain (zero weight cols
# / zero bias -> z_pad = 0 -> y_pad = beta_pad = 0), so padding never perturbs
# the real outputs or the next layer's matmul.
# ---------------------------------------------------------------------------
def _fused_chain_kernel(num_layers, b_valid, mxu_dtype, x_ref, *refs):
    """refs = [wt0,b0,g0,bt0, wt1,b1,g1,bt1, ..., z0,y0, z1,y1, ...]."""
    param_refs = refs[:4 * num_layers]
    out_refs = refs[4 * num_layers:]
    h = x_ref[...]                                     # (B_pad, F0_pad) f32
    row_mask = _row_mask(h.shape[0], b_valid)          # hoisted out of the loop
    inv_b = 1.0 / b_valid
    for i in range(num_layers):                        # static unroll
        wt_ref, b_ref, g_ref, bt_ref = param_refs[4 * i:4 * i + 4]
        z_ref, y_ref = out_refs[2 * i], out_refs[2 * i + 1]
        # Linear on the MXU with f32 accumulation.
        z = jnp.dot(h.astype(mxu_dtype), wt_ref[...].astype(mxu_dtype),
                    preferred_element_type=jnp.float32) + b_ref[...]
        z_ref[...] = z
        y = _bn_train(z, g_ref[...], bt_ref[...], inv_b, row_mask)
        y_ref[...] = y
        h = y                                          # stays on-chip


# ---------------------------------------------------------------------------
# Kernel 2: one Linear+BN layer, grid-tiled over F_out (per-feature BN stats
# make this tiling exact).  Used when the fused path would overflow VMEM.
# ---------------------------------------------------------------------------
def _linear_bn_tiled_kernel(b_valid, mxu_dtype, x_ref, wt_ref, b_ref, g_ref,
                            bt_ref, z_ref, y_ref):
    x = x_ref[...]
    z = jnp.dot(x.astype(mxu_dtype), wt_ref[...].astype(mxu_dtype),
                preferred_element_type=jnp.float32) + b_ref[...]
    z_ref[...] = z
    row_mask = _row_mask(x.shape[0], b_valid)
    y_ref[...] = _bn_train(z, g_ref[...], bt_ref[...], 1.0 / b_valid, row_mask)


def _fused_chain_call(x_pad, params, b_valid, mxu_dtype):
    B = x_pad.shape[0]
    num_layers = len(params)
    flat_in = [x_pad]
    out_shape = []
    est = x_pad.size * 4
    for (wt, b, g, bt) in params:
        flat_in += [wt, b, g, bt]
        fo = wt.shape[1]
        est += (wt.size + 3 * fo + 2 * B * fo) * 4
        out_shape += [jax.ShapeDtypeStruct((B, fo), jnp.float32)] * 2
    vmem_bytes = int(min(_VMEM_CAP, max(16 << 20, 2 * est + (2 << 20))))

    vmem = pl.BlockSpec(memory_space=pltpu.MemorySpace.VMEM)
    outs = pl.pallas_call(
        functools.partial(_fused_chain_kernel, num_layers, b_valid, mxu_dtype),
        out_shape=tuple(out_shape),
        in_specs=[vmem] * len(flat_in),
        out_specs=tuple(vmem for _ in out_shape),
        compiler_params=pltpu.CompilerParams(vmem_limit_bytes=vmem_bytes),
    )(*flat_in)
    return list(outs)


def _tiled_layer_call(h, wt, b, g, bt, b_valid, mxu_dtype):
    B, fin_pad = h.shape
    fout_pad = wt.shape[1]
    tn = 512 if fout_pad % 512 == 0 else (256 if fout_pad % 256 == 0 else _LANE)
    grid = (fout_pad // tn,)
    # Estimate: resident x + double-buffered weight/bias blocks + z/y blocks.
    est = (B * fin_pad + 2 * fin_pad * tn + 2 * 3 * tn + 2 * 2 * B * tn) * 4
    vmem_bytes = int(min(_VMEM_CAP, max(16 << 20, est + (2 << 20))))
    # TODO(synk): if fin_pad * tn alone overflows the VMEM cap, add an F_in
    # ("arbitrary") grid axis with a VMEM accumulator finalized via pl.when;
    # not needed for this module's layer widths.
    z, y = pl.pallas_call(
        functools.partial(_linear_bn_tiled_kernel, b_valid, mxu_dtype),
        out_shape=(jax.ShapeDtypeStruct((B, fout_pad), jnp.float32),
                   jax.ShapeDtypeStruct((B, fout_pad), jnp.float32)),
        grid_spec=pltpu.PrefetchScalarGridSpec(
            num_scalar_prefetch=0,
            grid=grid,
            in_specs=[
                pl.BlockSpec((B, fin_pad), lambda j: (0, 0)),   # resident
                pl.BlockSpec((fin_pad, tn), lambda j: (0, j)),
                pl.BlockSpec((1, tn), lambda j: (0, j)),
                pl.BlockSpec((1, tn), lambda j: (0, j)),
                pl.BlockSpec((1, tn), lambda j: (0, j)),
            ],
            out_specs=[
                pl.BlockSpec((B, tn), lambda j: (0, j)),
                pl.BlockSpec((B, tn), lambda j: (0, j)),
            ],
        ),
        compiler_params=pltpu.CompilerParams(
            dimension_semantics=("parallel",),
            vmem_limit_bytes=vmem_bytes),
    )(h, wt, b, g, bt)
    return z, y


def _forward_impl(x, params, *, f_outs, mxu_dtype, force_per_layer):
    B, fin = x.shape
    fin_pad = params[0][0].shape[0]
    B_pad = _pad_to(B, _SUBLANE)
    if fin != fin_pad or B != B_pad:
        x_pad = jnp.pad(x, ((0, B_pad - B), (0, fin_pad - fin)))
    else:
        x_pad = x

    # Static VMEM estimate decides fused-chain vs per-layer tiled path.
    est = B_pad * fin_pad * 4
    for (wt, b, g, bt) in params:
        fo = wt.shape[1]
        est += (wt.size + 3 * fo + 2 * B_pad * fo) * 4
    use_fused = (not force_per_layer) and est <= _FUSED_VMEM_BUDGET

    if use_fused:
        padded = _fused_chain_call(x_pad, params, B, mxu_dtype)
    else:
        padded = []
        h = x_pad
        for (wt, b, g, bt) in params:
            z, y = _tiled_layer_call(h, wt, b, g, bt, B, mxu_dtype)
            padded += [z, y]
            h = y

    # Strip batch / lane padding so outputs match the module's exact shapes.
    outs = []
    for i, fo in enumerate(f_outs):
        for p in (padded[2 * i], padded[2 * i + 1]):
            outs.append(p if p.shape == (B, fo) else p[:B, :fo])
    return tuple(outs), outs[-1]


class DLGNFCBNGatingNetworkPallas:
    """JAX/Pallas re-implementation of DLGN_FC_BN_Gating_Network.forward."""

    def __init__(self, nodes_in_each_layer_list, input_size, seed=0,
                 mxu_dtype=jnp.float32):
        key = jax.random.PRNGKey(seed)
        self.params = []        # kernel layout: pre-transposed, lane-padded
        self.params_ref = []    # original layout (for the pure-JAX reference)
        prev = input_size
        for n in nodes_in_each_layer_list:
            key, kw, kb = jax.random.split(key, 3)
            bound = 1.0 / float(prev) ** 0.5   # PyTorch nn.Linear default init
            w = jax.random.uniform(kw, (n, prev), jnp.float32, -bound, bound)
            b = jax.random.uniform(kb, (n,), jnp.float32, -bound, bound)
            gamma = jnp.ones((n,), jnp.float32)   # BatchNorm1d default weight
            beta = jnp.zeros((n,), jnp.float32)   # BatchNorm1d default bias
            self.params_ref.append((w, b, gamma, beta))

            fin_p, fout_p = _pad_to(prev, _LANE), _pad_to(n, _LANE)
            wt_p = jnp.zeros((fin_p, fout_p), jnp.float32).at[:prev, :n].set(w.T)
            b_p = jnp.zeros((1, fout_p), jnp.float32).at[0, :n].set(b)
            g_p = jnp.ones((1, fout_p), jnp.float32).at[0, :n].set(gamma)
            bt_p = jnp.zeros((1, fout_p), jnp.float32).at[0, :n].set(beta)
            self.params.append((wt_p, b_p, g_p, bt_p))
            prev = n

        f_outs = tuple(int(n) for n in nodes_in_each_layer_list)
        base = functools.partial(_forward_impl, f_outs=f_outs,
                                 mxu_dtype=mxu_dtype)
        self._fwd_auto = jax.jit(functools.partial(base, force_per_layer=False))
        self._fwd_tiled = jax.jit(functools.partial(base, force_per_layer=True))

    def forward(self, inp, force_per_layer=False):
        x = inp.reshape(inp.shape[0], -1).astype(jnp.float32)  # torch.flatten(inp, 1)
        fwd = self._fwd_tiled if force_per_layer else self._fwd_auto
        outs, final = fwd(x, self.params)
        return list(outs), final


def _reference_forward(model, inp):
    """Pure-JAX reference (unpadded params) for correctness checks."""
    x = inp.reshape(inp.shape[0], -1).astype(jnp.float32)
    outs = []
    for (w, b, gamma, beta) in model.params_ref:
        z = x @ w.T + b
        outs.append(z)
        mean = jnp.mean(z, axis=0, keepdims=True)
        var = jnp.mean((z - mean) ** 2, axis=0, keepdims=True)
        y = gamma * (z - mean) * lax.rsqrt(var + BN_EPS) + beta
        outs.append(y)
        x = y
    return outs, x


def _check(layer_outs, final_out, ref_outs, ref_final, tag):
    assert len(layer_outs) == len(ref_outs), tag
    for got, ref in zip(layer_outs, ref_outs):
        assert got.shape == ref.shape, tag
        assert jnp.allclose(got, ref, atol=2e-4, rtol=2e-4), tag
    assert jnp.allclose(final_out, ref_final, atol=2e-4, rtol=2e-4), tag


if __name__ == "__main__":
    # Small shapes consistent with the module: inp flattened to input_size=64.
    batch, c, h, w_ = 8, 4, 4, 4
    input_size = c * h * w_
    nodes = [64, 32]

    key = jax.random.PRNGKey(0)
    inp = jax.random.normal(key, (batch, c, h, w_), dtype=jnp.float32)

    model = DLGNFCBNGatingNetworkPallas(nodes, input_size, seed=0)
    ref_outs, ref_final = _reference_forward(model, inp)

    # 1) Fully fused single-kernel path (default for small nets).
    layer_outs, final_out = model.forward(inp)
    jax.block_until_ready(final_out)
    _check(layer_outs, final_out, ref_outs, ref_final, "fused path mismatch")

    # 2) F_out-tiled per-layer path (auto-selected for large nets); exercised
    #    explicitly here so both code paths are validated on TPU.
    layer_outs_t, final_out_t = model.forward(inp, force_per_layer=True)
    jax.block_until_ready(final_out_t)
    _check(layer_outs_t, final_out_t, ref_outs, ref_final, "tiled path mismatch")

    # 3) Batch not a multiple of 8: exercises the sublane-padding + masked BN
    #    statistics path.
    inp_odd = jax.random.normal(jax.random.PRNGKey(1), (6, c, h, w_),
                                dtype=jnp.float32)
    ref_outs_o, ref_final_o = _reference_forward(model, inp_odd)
    layer_outs_o, final_out_o = model.forward(inp_odd)
    jax.block_until_ready(final_out_o)
    _check(layer_outs_o, final_out_o, ref_outs_o, ref_final_o,
           "masked-batch path mismatch")

    print("KERNEL_OK")
</pallas_src>

<mosaic_0001>
module attributes {stable_mosaic.version = 11 : i64} {
  func.func @_fused_chain_kernel(%arg0: memref<8x128xf32, #tpu.memory_space<vmem>>, %arg1: memref<128x128xf32, #tpu.memory_space<vmem>>, %arg2: memref<1x128xf32, #tpu.memory_space<vmem>>, %arg3: memref<1x128xf32, #tpu.memory_space<vmem>>, %arg4: memref<1x128xf32, #tpu.memory_space<vmem>>, %arg5: memref<128x128xf32, #tpu.memory_space<vmem>>, %arg6: memref<1x128xf32, #tpu.memory_space<vmem>>, %arg7: memref<1x128xf32, #tpu.memory_space<vmem>>, %arg8: memref<1x128xf32, #tpu.memory_space<vmem>>, %arg9: memref<8x128xf32, #tpu.memory_space<vmem>>, %arg10: memref<8x128xf32, #tpu.memory_space<vmem>>, %arg11: memref<8x128xf32, #tpu.memory_space<vmem>>, %arg12: memref<8x128xf32, #tpu.memory_space<vmem>>) attributes {dimension_semantics = [], scalar_prefetch = 0 : i64, scratch_operands = 0 : i64, tpu.core_type = #tpu.core_type<tc>} {
    %c0 = arith.constant 0 : index
    %c0_0 = arith.constant 0 : index
    %0 = vector.load %arg0[%c0, %c0_0] : memref<8x128xf32, #tpu.memory_space<vmem>>, vector<8x128xf32>
    %c0_1 = arith.constant 0 : index
    %c0_2 = arith.constant 0 : index
    %1 = vector.load %arg1[%c0_1, %c0_2] : memref<128x128xf32, #tpu.memory_space<vmem>>, vector<128x128xf32>
    %cst = arith.constant dense<0.000000e+00> : vector<8x128xf32>
    %2 = tpu.matmul %0, %1, %cst {dimension_numbers = #tpu.dot_dimension_numbers<[1], [0], [0], [1], [0, 0, 1, 1], [], []>} : vector<8x128xf32>, vector<128x128xf32>, vector<8x128xf32> -> vector<8x128xf32>
    %c0_3 = arith.constant 0 : index
    %c0_4 = arith.constant 0 : index
    %3 = vector.load %arg2[%c0_3, %c0_4] : memref<1x128xf32, #tpu.memory_space<vmem>>, vector<1x128xf32>
    %4 = vector.broadcast %3 : vector<1x128xf32> to vector<8x128xf32>
    %5 = arith.addf %2, %4 : vector<8x128xf32>
    %c0_5 = arith.constant 0 : index
    %c0_6 = arith.constant 0 : index
    %6 = vector.load %arg9[%c0_5, %c0_6] : memref<8x128xf32, #tpu.memory_space<vmem>>, vector<8x128xf32>
    tpu.vector_store %arg9[%c0_5, %c0_6], %5 {strides = array<i32>} : memref<8x128xf32, #tpu.memory_space<vmem>>, vector<8x128xf32>,
    %c0_7 = arith.constant 0 : index
    %c0_8 = arith.constant 0 : index
    %7 = vector.load %arg3[%c0_7, %c0_8] : memref<1x128xf32, #tpu.memory_space<vmem>>, vector<1x128xf32>
    %c0_9 = arith.constant 0 : index
    %c0_10 = arith.constant 0 : index
    %8 = vector.load %arg4[%c0_9, %c0_10] : memref<1x128xf32, #tpu.memory_space<vmem>>, vector<1x128xf32>
    %cst_11 = arith.constant dense<0.000000e+00> : vector<128xf32>
    %9 = vector.multi_reduction <add>, %5, %cst_11 [0] : vector<8x128xf32> to vector<128xf32>
    %10 = vector.shape_cast %9 : vector<128xf32> to vector<1x128xf32>
    %cst_12 = arith.constant 1.250000e-01 : f32
    %11 = vector.broadcast %cst_12 : f32 to vector<1x128xf32>
    %12 = arith.mulf %10, %11 : vector<1x128xf32>
    %13 = vector.broadcast %12 : vector<1x128xf32> to vector<8x128xf32>
    %14 = arith.subf %5, %13 : vector<8x128xf32>
    %15 = arith.mulf %14, %14 : vector<8x128xf32>
    %cst_13 = arith.constant dense<0.000000e+00> : vector<128xf32>
    %16 = vector.multi_reduction <add>, %15, %cst_13 [0] : vector<8x128xf32> to vector<128xf32>
    %17 = vector.shape_cast %16 : vector<128xf32> to vector<1x128xf32>
    %cst_14 = arith.constant 1.250000e-01 : f32
    %18 = vector.broadcast %cst_14 : f32 to vector<1x128xf32>
    %19 = arith.mulf %17, %18 : vector<1x128xf32>
    %cst_15 = arith.constant 9.99999974E-6 : f32
    %20 = vector.broadcast %cst_15 : f32 to vector<1x128xf32>
    %21 = arith.addf %19, %20 : vector<1x128xf32>
    %22 = math.rsqrt %21 : vector<1x128xf32>
    %23 = arith.mulf %7, %22 : vector<1x128xf32>
    %24 = arith.mulf %12, %23 : vector<1x128xf32>
    %25 = arith.subf %8, %24 : vector<1x128xf32>
    %26 = vector.broadcast %23 : vector<1x128xf32> to vector<8x128xf32>
    %27 = arith.mulf %5, %26 : vector<8x128xf32>
    %28 = vector.broadcast %25 : vector<1x128xf32> to vector<8x128xf32>
    %29 = arith.addf %27, %28 : vector<8x128xf32>
    %c0_16 = arith.constant 0 : index
    %c0_17 = arith.constant 0 : index
    %30 = vector.load %arg10[%c0_16, %c0_17] : memref<8x128xf32, #tpu.memory_space<vmem>>, vector<8x128xf32>
    tpu.vector_store %arg10[%c0_16, %c0_17], %29 {strides = array<i32>} : memref<8x128xf32, #tpu.memory_space<vmem>>, vector<8x128xf32>,
    %c0_18 = arith.constant 0 : index
    %c0_19 = arith.constant 0 : index
    %31 = vector.load %arg5[%c0_18, %c0_19] : memref<128x128xf32, #tpu.memory_space<vmem>>, vector<128x128xf32>
    %cst_20 = arith.constant dense<0.000000e+00> : vector<8x128xf32>
    %32 = tpu.matmul %29, %31, %cst_20 {dimension_numbers = #tpu.dot_dimension_numbers<[1], [0], [0], [1], [0, 0, 1, 1], [], []>} : vector<8x128xf32>, vector<128x128xf32>, vector<8x128xf32> -> vector<8x128xf32>
    %c0_21 = arith.constant 0 : index
    %c0_22 = arith.constant 0 : index
    %33 = vector.load %arg6[%c0_21, %c0_22] : memref<1x128xf32, #tpu.memory_space<vmem>>, vector<1x128xf32>
    %34 = vector.broadcast %33 : vector<1x128xf32> to vector<8x128xf32>
    %35 = arith.addf %32, %34 : vector<8x128xf32>
    %c0_23 = arith.constant 0 : index
    %c0_24 = arith.constant 0 : index
    %36 = vector.load %arg11[%c0_23, %c0_24] : memref<8x128xf32, #tpu.memory_space<vmem>>, vector<8x128xf32>
    tpu.vector_store %arg11[%c0_23, %c0_24], %35 {strides = array<i32>} : memref<8x128xf32, #tpu.memory_space<vmem>>, vector<8x128xf32>,
    %c0_25 = arith.constant 0 : index
    %c0_26 = arith.constant 0 : index
    %37 = vector.load %arg7[%c0_25, %c0_26] : memref<1x128xf32, #tpu.memory_space<vmem>>, vector<1x128xf32>
    %c0_27 = arith.constant 0 : index
    %c0_28 = arith.constant 0 : index
    %38 = vector.load %arg8[%c0_27, %c0_28] : memref<1x128xf32, #tpu.memory_space<vmem>>, vector<1x128xf32>
    %cst_29 = arith.constant dense<0.000000e+00> : vector<128xf32>
    %39 = vector.multi_reduction <add>, %35, %cst_29 [0] : vector<8x128xf32> to vector<128xf32>
    %40 = vector.shape_cast %39 : vector<128xf32> to vector<1x128xf32>
    %cst_30 = arith.constant 1.250000e-01 : f32
    %41 = vector.broadcast %cst_30 : f32 to vector<1x128xf32>
    %42 = arith.mulf %40, %41 : vector<1x128xf32>
    %43 = vector.broadcast %42 : vector<1x128xf32> to vector<8x128xf32>
    %44 = arith.subf %35, %43 : vector<8x128xf32>
    %45 = arith.mulf %44, %44 : vector<8x128xf32>
    %cst_31 = arith.constant dense<0.000000e+00> : vector<128xf32>
    %46 = vector.multi_reduction <add>, %45, %cst_31 [0] : vector<8x128xf32> to vector<128xf32>
    %47 = vector.shape_cast %46 : vector<128xf32> to vector<1x128xf32>
    %cst_32 = arith.constant 1.250000e-01 : f32
    %48 = vector.broadcast %cst_32 : f32 to vector<1x128xf32>
    %49 = arith.mulf %47, %48 : vector<1x128xf32>
    %cst_33 = arith.constant 9.99999974E-6 : f32
    %50 = vector.broadcast %cst_33 : f32 to vector<1x128xf32>
    %51 = arith.addf %49, %50 : vector<1x128xf32>
    %52 = math.rsqrt %51 : vector<1x128xf32>
    %53 = arith.mulf %37, %52 : vector<1x128xf32>
    %54 = arith.mulf %42, %53 : vector<1x128xf32>
    %55 = arith.subf %38, %54 : vector<1x128xf32>
    %56 = vector.broadcast %53 : vector<1x128xf32> to vector<8x128xf32>
    %57 = arith.mulf %35, %56 : vector<8x128xf32>
    %58 = vector.broadcast %55 : vector<1x128xf32> to vector<8x128xf32>
    %59 = arith.addf %57, %58 : vector<8x128xf32>
    %c0_34 = arith.constant 0 : index
    %c0_35 = arith.constant 0 : index
    %60 = vector.load %arg12[%c0_34, %c0_35] : memref<8x128xf32, #tpu.memory_space<vmem>>, vector<8x128xf32>
    tpu.vector_store %arg12[%c0_34, %c0_35], %59 {strides = array<i32>} : memref<8x128xf32, #tpu.memory_space<vmem>>, vector<8x128xf32>,
    return
  }
}

</mosaic_0001>

<bundles_post_ra>
// kernel: _forward_impl.1
= control target key start
LH: loop header
LB: loop body
LE: loop exit
PB: predicated region body
PF: predicated region fallthrough
CT: control target
= control target key end

     0   :  { %18 = vsyncpa [#allocation3], 0  ;;  %s845_s0 = inlined_call_operand.vmem [shape: f32[8,128], index: 0, kind: input, shape index: {}]   ;;  %s846_s1 = inlined_call_operand.hbm [shape: f32[128,128], index: 1, kind: input, shape index: {}]   ;;  %s847_s2 = inlined_call_operand.vmem [shape: f32[1,128], index: 2, kind: input, shape index: {}]   ;;  %s848_s3 = inlined_call_operand.vmem [shape: f32[1,128], index: 3, kind: input, shape index: {}]   ;;  %s849_s4 = inlined_call_operand.vmem [shape: f32[1,128], index: 4, kind: input, shape index: {}]   ;;  %s850_s5 = inlined_call_operand.hbm [shape: f32[128,128], index: 5, kind: input, shape index: {}]   ;;  %s851_s6 = inlined_call_operand.vmem [shape: f32[1,128], index: 6, kind: input, shape index: {}]   ;;  %s852_s7 = inlined_call_operand.vmem [shape: f32[1,128], index: 7, kind: input, shape index: {}]   ;;  %s853_s8 = inlined_call_operand.vmem [shape: f32[1,128], index: 8, kind: input, shape index: {}]   ;;  %s854_s9 = inlined_call_operand.hbm [shape: f32[8,128], index: 9, kind: output, shape index: {0}]   ;;  %s855_s10 = inlined_call_operand.hbm [shape: f32[8,128], index: 10, kind: output, shape index: {1}]   ;;  %s856_s11 = inlined_call_operand.hbm [shape: f32[8,128], index: 11, kind: output, shape index: {2}]   ;;  %s857_s12 = inlined_call_operand.vmem [shape: f32[8,128], index: 12, kind: output, shape index: {3}]  }
   0x1   :  { %19 = vsyncpa [#allocation6], 0 }
   0x2   :  { %20 = vsyncpa [#allocation4], 0 }
   0x3   :  { %21 = vsyncpa [#allocation9], 0  ;;  %s664_s21 = smov [#allocation2]   ;;  %s546_s25 = scalar_lea.hbm %s846_s1, 2048 }
   0x4   :  { %s29_s22 = sshll.u32 %s664_s21, 4  ;;  %p547_p0 = scmp.ne.s32.totalorder %s846_s1, %s546_s25  ;;  %s30_s22 = int_to_ptr.vmem [resolvable:$true] %s29_s22 }
   0x5   :  { %p550_p1 = scmp.lt.u32.totalorder %s546_s25, %s846_s1 }
   0x7   :  { %p552_p2 = pnand %p550_p1, %p547_p0 }
   0x9   :  { %555 = shalt.err (!%p552_p2)
}
   0xa   :  { %s556_s30 = scalar_lea.vmem %s30_s22, 2048  ;;  %p561_p4 = scmp.lt.s32.totalorder %s30_s22, %s30_s22 }
   0xb   :  { %p557_p3 = scmp.ne.s32.totalorder %s30_s22, %s556_s30  ;;  %p562_p5 = scmp.lt.s32.totalorder %s556_s30, %s556_s30 }
   0xd   :  { %p563_p6 = por %p562_p5, %p561_p4 }
   0xf   :  { %p564_p7 = pnand %p563_p6, %p557_p3 }
  0x11   :  { %567 = shalt.err (!%p564_p7)
}
  0x12   :  { %s665_s13 = smov 128   ;;  %s666_s14 = smov 8  }
  0x13   :  { %35 = dma.hbm_to_vmem [thread:$0]  %s846_s1, 2048, %s30_s22, [#allocation3], %s665_s13, %s665_s13, %s666_s14  }
  0x14   :  { %s667_s17 = smov [#allocation5]   ;;  %s568_s21 = scalar_lea.hbm %s850_s5, 2048 }
  0x15   :  { %s47_s18 = sshll.u32 %s667_s17, 4  ;;  %p569_p8 = scmp.ne.s32.totalorder %s850_s5, %s568_s21  ;;  %s48_s18 = int_to_ptr.vmem [resolvable:$true] %s47_s18 }
  0x16   :  { %p572_p9 = scmp.lt.u32.totalorder %s568_s21, %s850_s5 }
  0x18   :  { %p574_p10 = pnand %p572_p9, %p569_p8 }
  0x1a   :  { %577 = shalt.err (!%p574_p10)
}
  0x1b   :  { %s578_s27 = scalar_lea.vmem %s48_s18, 2048  ;;  %p583_p12 = scmp.lt.s32.totalorder %s48_s18, %s48_s18 }
  0x1c   :  { %p579_p11 = scmp.ne.s32.totalorder %s48_s18, %s578_s27  ;;  %p584_p13 = scmp.lt.s32.totalorder %s578_s27, %s578_s27 }
  0x1e   :  { %p585_p0 = por %p584_p13, %p583_p12 }
  0x20   :  { %p586_p1 = pnand %p585_p0, %p579_p11 }
  0x22   :  { %589 = shalt.err (!%p586_p1)
}
  0x23   :  { %53 = dma.hbm_to_vmem [thread:$0]  %s850_s5, 2048, %s48_s18, [#allocation6], %s665_s13, %s665_s13, %s666_s14  }
  0x24   :  { %656 = dma.done.wait [#allocation3], 2048  }
  0x25   :  { %657 = vsyncadd [#allocation3], 4294965248 }
  0x26   :  { %658 = dma.done.wait [#allocation6], 2048  }
  0x27   :  { %659 = vsyncadd [#allocation6], 4294965248  ;;  %v668_v0 = vmov 0.0|0.0   ;;  %vm669_vm0 = vmmov 0   ;;  %v670_v1 = vmov 0.0   ;;  %v67_v2 = vld [vmem:[#allocation2] sm:$0xff] }
  0x28   :  { %484 = vmatprep.subr.bf16.mxu0 %v668_v0  ;;  %446 = vmatprep.mubr.msk.f32.mxu0 %vm669_vm0, %v670_v1  ;;  %v68_v3 = vld [vmem:[#allocation2 + $0x8] sm:$0xff]  ;;  %v69_v4 = vld [vmem:[#allocation2 + $0x10] sm:$0xff]  ;;  %v70_v6 = vld [vmem:[#allocation2 + $0x18] sm:$0xff]  ;;  %s671_s15 = smov [#allocation8]   ;;  %s672_s16 = smov [#allocation7]  }
  0x29   :  { %508 = vmatprep.subr.bf16.mxu1 %v668_v0  ;;  %481 = vmatprep.mubr.msk.f32.mxu1 %vm669_vm0, %v670_v1  ;;  %v485_v5 = vpack.c.bf16 %v68_v3, %v67_v2  ;;  %v488_v7 = vpack.c.bf16 %v70_v6, %v69_v4  ;;  %v71_v8 = vld [vmem:[#allocation2 + $0x20] sm:$0xff]  ;;  %v72_v9 = vld [vmem:[#allocation2 + $0x28] sm:$0xff]  ;;  %v73_v11 = vld [vmem:[#allocation2 + $0x30] sm:$0xff]  ;;  %s337_s17 = sshll.u32 %s672_s16, 4  ;;  %s338_s17 = int_to_ptr.vmem [resolvable:$true] %s337_s17 }
  0x2a   :  { %v491_v10 = vpack.c.bf16 %v72_v9, %v71_v8  ;;  %v74_v12 = vld [vmem:[#allocation2 + $0x38] sm:$0xff]  ;;  %v75_v14 = vld [vmem:[#allocation2 + $0x40] sm:$0xff]  ;;  %v76_v15 = vld [vmem:[#allocation2 + $0x48] sm:$0xff]  ;;  %v185_v8 = vlaneseq }
  0x2b   :  { %486 = vmatpush3.bf16.msra.mxu0 %v485_v5  ;;  %v494_v13 = vpack.c.bf16 %v74_v12, %v73_v11  ;;  %v497_v16 = vpack.c.bf16 %v76_v15, %v75_v14  ;;  %v77_v17 = vld [vmem:[#allocation2 + $0x50] sm:$0xff]  ;;  %v78_v18 = vld [vmem:[#allocation2 + $0x58] sm:$0xff]  ;;  %v79_v20 = vld [vmem:[#allocation2 + $0x60] sm:$0xff] }
  0x2c   :  { %487 = vmatprep.subr.bf16.mxu0 %v668_v0  ;;  %v500_v19 = vpack.c.bf16 %v78_v18, %v77_v17  ;;  %v80_v21 = vld [vmem:[#allocation2 + $0x68] sm:$0xff]  ;;  %v81_v23 = vld [vmem:[#allocation2 + $0x70] sm:$0xff]  ;;  %v82_v24 = vld [vmem:[#allocation2 + $0x78] sm:$0xff]  ;;  %v186_v9 = vshrl.u32 %v185_v8, 7 }
  0x2d   :  { %v503_v22 = vpack.c.bf16 %v80_v21, %v79_v20  ;;  %v506_v25 = vpack.c.bf16 %v82_v24, %v81_v23  ;;  %v66_v26 = vld [vmem:[%s845_s0] sm:$0xff]  ;;  %v200_v28 = vld [vmem:[#allocation5 + $0x8] sm:$0xff]  ;;  %v201_v29 = vld [vmem:[#allocation5 + $0x10] sm:$0xff] }
  0x2e   :  { %v199_v27 = vld [vmem:[#allocation5] sm:$0xff]  ;;  %v202_v31 = vld [vmem:[#allocation5 + $0x18] sm:$0xff]  ;;  %v204_v34 = vld [vmem:[#allocation5 + $0x28] sm:$0xff]  ;;  %v788_v11 = vsub.s32 0, %v186_v9 }
  0x2f   :  { %489 = vmatpush3.bf16.msra.mxu0 %v488_v7  ;;  %v509_v30 = vpack.c.bf16 %v200_v28, %v199_v27  ;;  %v512_v32 = vpack.c.bf16 %v202_v31, %v201_v29  ;;  %v203_v33 = vld [vmem:[#allocation5 + $0x20] sm:$0xff]  ;;  %v205_v36 = vld [vmem:[#allocation5 + $0x30] sm:$0xff]  ;;  %v206_v37 = vld [vmem:[#allocation5 + $0x38] sm:$0xff] }
  0x30   :  { %490 = vmatprep.subr.bf16.mxu0 %v668_v0  ;;  %v515_v35 = vpack.c.bf16 %v204_v34, %v203_v33  ;;  %v518_v38 = vpack.c.bf16 %v206_v37, %v205_v36  ;;  %v207_v39 = vld [vmem:[#allocation5 + $0x40] sm:$0xff]  ;;  %v208_v40 = vld [vmem:[#allocation5 + $0x48] sm:$0xff]  ;;  %v209_v42 = vld [vmem:[#allocation5 + $0x50] sm:$0xff] }
  0x31   :  { %510 = vmatpush3.bf16.msra.mxu1 %v509_v30  ;;  %v521_v41 = vpack.c.bf16 %v208_v40, %v207_v39  ;;  %v210_v43 = vld [vmem:[#allocation5 + $0x58] sm:$0xff]  ;;  %v211_v45 = vld [vmem:[#allocation5 + $0x60] sm:$0xff]  ;;  %v212_v46 = vld [vmem:[#allocation5 + $0x68] sm:$0xff] }
  0x32   :  { %511 = vmatprep.subr.bf16.mxu1 %v668_v0  ;;  %v524_v44 = vpack.c.bf16 %v210_v43, %v209_v42  ;;  %v527_v47 = vpack.c.bf16 %v212_v46, %v211_v45  ;;  %v213_v48 = vld [vmem:[#allocation5 + $0x70] sm:$0xff]  ;;  %v214_v49 = vld [vmem:[#allocation5 + $0x78] sm:$0xff]  ;;  %v378_v51 = vld [vmem:[%s847_s2] ss:$0 sm:$0xff] }
  0x33   :  { %492 = vmatpush3.bf16.msra.mxu0 %v491_v10  ;;  %v530_v50 = vpack.c.bf16 %v214_v49, %v213_v48  ;;  %v161_v10 = vld [vmem:[%s848_s3] sm:$0x1]  ;;  %s347_s3 = sshll.u32 %s671_s15, 4  ;;  %s348_s3 = int_to_ptr.vmem [resolvable:$true] %s347_s3 }
  0x34   :  { %493 = vmatprep.subr.bf16.mxu0 %v668_v0  ;;  %v162_v14 = vld [vmem:[%s849_s4] sm:$0x1]  ;;  %s590_s18 = scalar_lea.vmem %s348_s3, 128  ;;  %p595_p3 = scmp.lt.s32.totalorder %s348_s3, %s348_s3 }
  0x35   :  { %513 = vmatpush3.bf16.msra.mxu1 %v512_v32  ;;  %p591_p2 = scmp.ne.s32.totalorder %s348_s3, %s590_s18  ;;  %p596_p4 = scmp.lt.s32.totalorder %s590_s18, %s590_s18 }
  0x36   :  { %514 = vmatprep.subr.bf16.mxu1 %v668_v0 }
  0x37   :  { %495 = vmatpush3.bf16.msra.mxu0 %v494_v13  ;;  %p597_p5 = por %p596_p4, %p595_p3 }
  0x38   :  { %496 = vmatprep.subr.bf16.mxu0 %v668_v0 }
  0x39   :  { %516 = vmatpush3.bf16.msra.mxu1 %v515_v35  ;;  %p598_p6 = pnand %p597_p5, %p591_p2 }
  0x3a   :  { %517 = vmatprep.subr.bf16.mxu1 %v668_v0 }
  0x3b   :  { %498 = vmatpush3.bf16.msra.mxu0 %v497_v16 }
  0x3c   :  { %499 = vmatprep.subr.bf16.mxu0 %v668_v0 }
  0x3d   :  { %519 = vmatpush3.bf16.msra.mxu1 %v518_v38 }
  0x3e   :  { %520 = vmatprep.subr.bf16.mxu1 %v668_v0 }
  0x3f   :  { %501 = vmatpush3.bf16.msra.mxu0 %v500_v19 }
  0x40   :  { %502 = vmatprep.subr.bf16.mxu0 %v668_v0 }
  0x41   :  { %522 = vmatpush3.bf16.msra.mxu1 %v521_v41 }
  0x42   :  { %523 = vmatprep.subr.bf16.mxu1 %v668_v0 }
  0x43   :  { %504 = vmatpush3.bf16.msra.mxu0 %v503_v22 }
  0x44   :  { %505 = vmatprep.subr.bf16.mxu0 %v668_v0 }
  0x45   :  { %525 = vmatpush3.bf16.msra.mxu1 %v524_v44 }
  0x46   :  { %526 = vmatprep.subr.bf16.mxu1 %v668_v0 }
  0x47   :  { %507 = vmatpush3.bf16.msra.mxu0 %v506_v25 }
  0x49   :  { %528 = vmatpush3.bf16.msra.mxu1 %v527_v47 }
  0x4a   :  { %447 = vmatmul.mubr.f32.vlgmr.msra.gmra.mrb[0].mxu0 %v66_v26  ;;  %529 = vmatprep.subr.bf16.mxu1 %v668_v0 }
  0x4d   :  { %531 = vmatpush3.bf16.msra.mxu1 %v530_v50 }
 0x11d   :  { %v156_v52 = vpop.f32.mrb[0].mxu0 }
 0x11e   :  { %v157_v53 = vadd.f32 %v378_v51, %v156_v52  ;;  %v448_v54 = vpop.f32.mrb[1].mxu0 }
 0x120   :  { %v163_v55 = vrot.slane %v157_v53, 4  ;;  %160 = vst [vmem:[#allocation7] sm:$0xff] %v157_v53 }
 0x122   :  { %v164_v56 = vadd.f32 %v163_v55, %v157_v53 }
 0x124   :  { %v165_v57 = vrot.slane %v164_v56, 2 }
 0x126   :  { %v166_v58 = vadd.f32 %v165_v57, %v164_v56 }
 0x128   :  { %v167_v59 = vrot.slane %v166_v58, 1 }
 0x12a   :  { %v168_v60 = vadd.f32 %v167_v59, %v166_v58 }
 0x12c   :  { %v169_v61 = vmul.f32 0.125, %v168_v60 }
 0x12e   :  { %v170_v62 = vsub.f32 %v157_v53, %v169_v61 }
 0x130   :  { %v171_v63 = vmul.f32 %v170_v62, %v170_v62 }
 0x132   :  { %v172_v1 = vrot.slane %v171_v63, 4 }
 0x134   :  { %v173_v0 = vadd.f32 %v172_v1, %v171_v63 }
 0x136   :  { %v174_v2 = vrot.slane %v173_v0, 2 }
 0x138   :  { %v175_v3 = vadd.f32 %v174_v2, %v173_v0 }
 0x13a   :  { %v176_v4 = vrot.slane %v175_v3, 1 }
 0x13c   :  { %v177_v5 = vadd.f32 %v176_v4, %v175_v3 }
 0x13e   :  { %v178_v6 = vmul.f32 0.125, %v177_v5 }
 0x140   :  { %v179_v7 = vadd.f32 1e-05, %v178_v6 }
 0x142   :  { %542 = vrsqrt.f32 %v179_v7 }
 0x14c   :  { %v543_v12 = vpop.eup %542 }
 0x14d   :  { %v181_v13 = vmul.f32 %v543_v12, %v161_v10 }
 0x14f   :  { %v182_v15 = vmul.f32 %v181_v13, %v169_v61  ;;  %v188_v16 = vrot.slane %v181_v13, %v788_v11 }
 0x151   :  { %v183_v17 = vsub.f32 %v162_v14, %v182_v15  ;;  %v190_v18 = vmul.f32 %v188_v16, %v157_v53 }
 0x153   :  { %v195_v19 = vrot.slane %v183_v17, %v788_v11 }
 0x155   :  { %v197_v20 = vadd.f32 %v195_v19, %v190_v18 }
 0x157   :  { %482 = vmatmul.mubr.f32.vlgmr.msra.gmra.mrb[0].mxu1 %v197_v20  ;;  %198 = vst [vmem:[#allocation8] sm:$0xff] %v197_v20 }
 0x158   :  { %601 = shalt.err (!%p598_p6)
}
 0x159   :  { %s602_s20 = scalar_lea.hbm %s855_s10, 128 }
 0x15a   :  { %p603_p7 = scmp.ne.s32.totalorder %s855_s10, %s602_s20  ;;  %p606_p8 = scmp.lt.u32.totalorder %s602_s20, %s855_s10 }
 0x15c   :  { %p608_p9 = pnand %p606_p8, %p603_p7 }
 0x15e   :  { %611 = shalt.err (!%p608_p9)
}
 0x15f   :  { %350 = dma.vmem_to_hbm [thread:$0]  %s348_s3, 128, %s855_s10, [#allocation9]  }
 0x160   :  { %s612_s1 = scalar_lea.vmem %s338_s17, 128  ;;  %p617_p11 = scmp.lt.s32.totalorder %s338_s17, %s338_s17 }
 0x161   :  { %p613_p10 = scmp.ne.s32.totalorder %s338_s17, %s612_s1  ;;  %p618_p12 = scmp.lt.s32.totalorder %s612_s1, %s612_s1 }
 0x163   :  { %p619_p13 = por %p618_p12, %p617_p11 }
 0x165   :  { %p620_p0 = pnand %p619_p13, %p613_p10 }
 0x167   :  { %623 = shalt.err (!%p620_p0)
}
 0x168   :  { %s624_s28 = scalar_lea.hbm %s854_s9, 128 }
 0x169   :  { %p625_p1 = scmp.ne.s32.totalorder %s854_s9, %s624_s28  ;;  %p628_p2 = scmp.lt.u32.totalorder %s624_s28, %s854_s9 }
 0x16b   :  { %p630_p3 = pnand %p628_p2, %p625_p1 }
 0x16d   :  { %633 = shalt.err (!%p630_p3)
}
 0x16e   :  { %340 = dma.vmem_to_hbm [thread:$0]  %s338_s17, 128, %s854_s9, [#allocation4]   ;;  %v379_v21 = vld [vmem:[%s851_s6] ss:$0 sm:$0xff] }
 0x16f   :  { %s673_s3 = smov [#allocation10]  }
 0x170   :  { %s357_s16 = sshll.u32 %s673_s3, 4  ;;  %s358_s16 = int_to_ptr.vmem [resolvable:$true] %s357_s16 }
 0x171   :  { %s634_s18 = scalar_lea.vmem %s358_s16, 128  ;;  %p639_p5 = scmp.lt.s32.totalorder %s358_s16, %s358_s16 }
 0x172   :  { %p635_p4 = scmp.ne.s32.totalorder %s358_s16, %s634_s18  ;;  %p640_p6 = scmp.lt.s32.totalorder %s634_s18, %s634_s18 }
 0x174   :  { %p641_p7 = por %p640_p6, %p639_p5 }
 0x176   :  { %p642_p8 = pnand %p641_p7, %p635_p4 }
 0x22a   :  { %v288_v22 = vpop.f32.mrb[0].mxu1 }
 0x22b   :  { %v289_v23 = vadd.f32 %v379_v21, %v288_v22  ;;  %v483_v24 = vpop.f32.mrb[1].mxu1 }
 0x22d   :  { %v295_v25 = vrot.slane %v289_v23, 4  ;;  %292 = vst [vmem:[#allocation10] sm:$0xff] %v289_v23 }
 0x22e   :  { %645 = shalt.err (!%p642_p8)
}
 0x22f   :  { %s646_s4 = scalar_lea.hbm %s856_s11, 128 }
 0x230   :  { %p647_p9 = scmp.ne.s32.totalorder %s856_s11, %s646_s4  ;;  %p650_p10 = scmp.lt.u32.totalorder %s646_s4, %s856_s11 }
 0x232   :  { %p652_p11 = pnand %p650_p10, %p647_p9 }
 0x234   :  { %655 = shalt.err (!%p652_p11)
}
 0x235   :  { %360 = dma.vmem_to_hbm [thread:$0]  %s358_s16, 128, %s856_s11, [#allocation9]   ;;  %v296_v26 = vadd.f32 %v295_v25, %v289_v23  ;;  %v293_v42 = vld [vmem:[%s852_s7] sm:$0x1] }
 0x236   :  { %v294_v45 = vld [vmem:[%s853_s8] sm:$0x1] }
 0x237   :  { %v297_v27 = vrot.slane %v296_v26, 2 }
 0x239   :  { %v298_v28 = vadd.f32 %v297_v27, %v296_v26 }
 0x23b   :  { %v299_v29 = vrot.slane %v298_v28, 1 }
 0x23d   :  { %v300_v30 = vadd.f32 %v299_v29, %v298_v28 }
 0x23f   :  { %v301_v31 = vmul.f32 0.125, %v300_v30 }
 0x241   :  { %v302_v32 = vsub.f32 %v289_v23, %v301_v31 }
 0x243   :  { %v303_v33 = vmul.f32 %v302_v32, %v302_v32 }
 0x245   :  { %v304_v34 = vrot.slane %v303_v33, 4 }
 0x247   :  { %v305_v35 = vadd.f32 %v304_v34, %v303_v33 }
 0x249   :  { %v306_v36 = vrot.slane %v305_v35, 2 }
 0x24b   :  { %v307_v37 = vadd.f32 %v306_v36, %v305_v35 }
 0x24d   :  { %v308_v38 = vrot.slane %v307_v37, 1 }
 0x24f   :  { %v309_v39 = vadd.f32 %v308_v38, %v307_v37 }
 0x251   :  { %v310_v40 = vmul.f32 0.125, %v309_v39 }
 0x253   :  { %v311_v41 = vadd.f32 1e-05, %v310_v40 }
 0x255   :  { %544 = vrsqrt.f32 %v311_v41 }
 0x25f   :  { %v545_v43 = vpop.eup %544 }
 0x260   :  { %v313_v44 = vmul.f32 %v545_v43, %v293_v42 }
 0x262   :  { %v314_v46 = vmul.f32 %v313_v44, %v301_v31  ;;  %v320_v47 = vrot.slane %v313_v44, %v788_v11 }
 0x264   :  { %v315_v48 = vsub.f32 %v294_v45, %v314_v46  ;;  %v322_v49 = vmul.f32 %v320_v47, %v289_v23 }
 0x266   :  { %v327_v50 = vrot.slane %v315_v48, %v788_v11 }
 0x268   :  { %v329_v51 = vadd.f32 %v327_v50, %v322_v49 }
 0x26a   :  { %330 = vst [vmem:[%s857_s12] sm:$0xff] %v329_v51 }
 0x26b   :  { %660 = dma.done.wait [#allocation4], 128  }
 0x26c   :  { %661 = vsyncadd [#allocation4], 4294967168 }
 0x26d   :  { %662 = dma.done.wait [#allocation9], 256  }
 0x26e   :  { %663 = vsyncadd [#allocation9], 4294967040 }
 0x26f   :  { %374 = vsyncpa [#allocation3], 1 }
 0x270   :  { %375 = vsyncpa [#allocation6], 1 }
 0x271   :  { %376 = vsyncpa [#allocation4], 1 }
 0x272   :  { %377 = vsyncpa [#allocation9], 1 }

</bundles_post_ra>
